<compile_context>
chip_gen: v6e
topology: v6e:2x2x1
jax: 0.10.0
libtpu: 0.0.40
codegen_flags: <defaults>
</compile_context>

<pallas_src>
import functools

import jax
import jax.numpy as jnp
import numpy as np
from jax.experimental import pallas as pl
from jax.experimental.pallas import tpu as pltpu

DEPTH = 3
BATCH = 4
NUM_NODES = 16
NUM_EDGES = 32
HIDDEN = 32


def _mpn_kernel(h_ref, g_ref, s_ref, we_ref, be_ref, wcat_ref, ba_ref, out_ref,
                *, depth):
    h = h_ref[0]                                  # [N, Hp]  f32 node embeddings
    G = g_ref[0].astype(jnp.float32)              # [E, N]   gather one-hot (src nodes)
    S = s_ref[0].astype(jnp.float32)              # [E, N]   scatter one-hot (dst nodes)
    We = we_ref[...]                              # [Hp, Hp] edge-transform weight
    Wcat = wcat_ref[...]                          # [2Hp,Hp] fused [Wa; Wh]

    n, hp = h.shape
    e = G.shape[0]
    # Hoist bias broadcasts out of the unrolled depth loop (JAX doesn't CSE them).
    be_b = jnp.broadcast_to(be_ref[...], (e, hp))     # [E, Hp]
    ba_b = jnp.broadcast_to(ba_ref[...], (n, hp))     # [N, Hp]

    for _ in range(depth):
        # Edge transform folded into node space: (G @ h) @ We == G @ (h @ We).
        hw = jnp.dot(h, We, preferred_element_type=jnp.float32)              # [N, Hp]
        em = jnp.maximum(
            jnp.dot(G, hw, preferred_element_type=jnp.float32) + be_b, 0.0)  # [E, Hp]
        # Scatter-add over edges: act[i] = sum_e S[e, i] * em[e]  (S^T @ em).
        act = jax.lax.dot_general(S, em, (((0,), (0,)), ((), ())),
                                  preferred_element_type=jnp.float32)        # [N, Hp]
        # Fused node update: ReLU(concat(act, h) @ [Wa; Wh] + ba), one K=2*Hp dot.
        cat = jnp.concatenate([act, h], axis=-1)                             # [N, 2Hp]
        h = jnp.maximum(
            jnp.dot(cat, Wcat, preferred_element_type=jnp.float32) + ba_b, 0.0)

    out_ref[0] = h.astype(out_ref.dtype)


def message_passing_network(node_embedding, incidence, params, *, depth=DEPTH):
    """Pallas-backed MessagePassingNetwork.forward.

    node_embedding : [N, H] or [B, N, H] float32
    incidence      : [2, E] or [B, 2, E] int32
    params         : dict of We [H,H], be [H], Wa [H,H], Wh [H,H], ba [H]
    """
    single = node_embedding.ndim == 2
    if single:
        node_embedding = node_embedding[None]
        incidence = incidence[None]

    b, n, h = node_embedding.shape
    e = incidence.shape[-1]
    hp = ((h + 127) // 128) * 128        # lane-dense hidden (pad to full 128-lane rows)
    pad = hp - h

    # Zero padding is exact: padded columns stay identically 0 through the network.
    h0 = jnp.pad(node_embedding.astype(jnp.float32), ((0, 0), (0, 0), (0, pad)))
    we = jnp.pad(params["We"].astype(jnp.float32), ((0, pad), (0, pad)))
    be = jnp.pad(params["be"].astype(jnp.float32), (0, pad)).reshape(1, hp)
    wa = jnp.pad(params["Wa"].astype(jnp.float32), ((0, pad), (0, pad)))
    wh = jnp.pad(params["Wh"].astype(jnp.float32), ((0, pad), (0, pad)))
    wcat = jnp.concatenate([wa, wh], axis=0)                                 # [2Hp, Hp]
    ba = jnp.pad(params["ba"].astype(jnp.float32), (0, pad)).reshape(1, hp)

    # Dense one-hot gather / scatter matrices (0/1 values are exact in bf16).
    gather = jax.nn.one_hot(incidence[:, 1, :], n, dtype=jnp.bfloat16)       # [B, E, N]
    scatter = jax.nn.one_hot(incidence[:, 0, :], n, dtype=jnp.bfloat16)      # [B, E, N]
    # TODO(synk): for real graph sizes the O(E*N) one-hots should be replaced by a
    # PrefetchScalarGridSpec gather/scatter (incidence in SMEM) to stay within VMEM.

    kernel = functools.partial(_mpn_kernel, depth=depth)
    out = pl.pallas_call(
        kernel,
        out_shape=jax.ShapeDtypeStruct((b, n, hp), jnp.float32),
        grid=(b,),
        in_specs=[
            pl.BlockSpec((1, n, hp), lambda g: (g, 0, 0)),    # node embeddings (per graph)
            pl.BlockSpec((1, e, n), lambda g: (g, 0, 0)),     # gather one-hot (per graph)
            pl.BlockSpec((1, e, n), lambda g: (g, 0, 0)),     # scatter one-hot (per graph)
            pl.BlockSpec((hp, hp), lambda g: (0, 0)),         # We          (resident)
            pl.BlockSpec((1, hp), lambda g: (0, 0)),          # be          (resident)
            pl.BlockSpec((2 * hp, hp), lambda g: (0, 0)),     # [Wa; Wh]    (resident)
            pl.BlockSpec((1, hp), lambda g: (0, 0)),          # ba          (resident)
        ],
        out_specs=pl.BlockSpec((1, n, hp), lambda g: (g, 0, 0)),
        compiler_params=pltpu.CompilerParams(
            dimension_semantics=("parallel",)),
    )(h0, gather, scatter, we, be, wcat, ba)

    out = out[..., :h]
    return out[0] if single else out


def reference_forward(node_embedding, incidence, params, *, depth=DEPTH):
    """Plain-JAX reference mirroring the PyTorch semantics exactly (single graph)."""
    h = node_embedding
    n = h.shape[0]
    for _ in range(depth):
        em = h[incidence[1]]                                          # index_select
        em = jnp.maximum(em @ params["We"] + params["be"], 0.0)       # edge transform
        act = jax.ops.segment_sum(em, incidence[0], num_segments=n)   # index_add_
        h = jnp.maximum(act @ params["Wa"] + h @ params["Wh"] + params["ba"], 0.0)
    return h


if __name__ == "__main__":
    key = jax.random.PRNGKey(0)
    k_h, k_i0, k_i1, k_we, k_be, k_wa, k_wh, k_ba = jax.random.split(key, 8)

    node_embedding = jax.random.normal(
        k_h, (BATCH, NUM_NODES, HIDDEN), dtype=jnp.float32)
    incidence = jnp.stack([
        jax.random.randint(k_i0, (BATCH, NUM_EDGES), 0, NUM_NODES, dtype=jnp.int32),
        jax.random.randint(k_i1, (BATCH, NUM_EDGES), 0, NUM_NODES, dtype=jnp.int32),
    ], axis=1)                                                        # [B, 2, E]

    scale = 1.0 / np.sqrt(HIDDEN)
    params = {
        "We": scale * jax.random.normal(k_we, (HIDDEN, HIDDEN), dtype=jnp.float32),
        "be": 0.1 * jax.random.normal(k_be, (HIDDEN,), dtype=jnp.float32),
        "Wa": scale * jax.random.normal(k_wa, (HIDDEN, HIDDEN), dtype=jnp.float32),
        "Wh": scale * jax.random.normal(k_wh, (HIDDEN, HIDDEN), dtype=jnp.float32),
        "ba": 0.1 * jax.random.normal(k_ba, (HIDDEN,), dtype=jnp.float32),
    }

    # Batched path (grid over graphs).
    out = jax.block_until_ready(message_passing_network(node_embedding, incidence, params))
    ref = jnp.stack([reference_forward(node_embedding[i], incidence[i], params)
                     for i in range(BATCH)])
    ref = jax.block_until_ready(ref)
    np.testing.assert_allclose(np.asarray(out), np.asarray(ref), rtol=1e-3, atol=1e-3)

    # Single-graph path (matches the original module's [N,H] / [2,E] signature).
    out1 = jax.block_until_ready(
        message_passing_network(node_embedding[0], incidence[0], params))
    np.testing.assert_allclose(np.asarray(out1), np.asarray(ref[0]), rtol=1e-3, atol=1e-3)

    print("KERNEL_OK")
</pallas_src>

<mosaic_0001>
module attributes {stable_mosaic.version = 11 : i64} {
  func.func @_mpn_kernel(%arg0: i32, %arg1: memref<1x16x128xf32, #tpu.memory_space<vmem>>, %arg2: memref<1x32x16xbf16, #tpu.memory_space<vmem>>, %arg3: memref<1x32x16xbf16, #tpu.memory_space<vmem>>, %arg4: memref<128x128xf32, #tpu.memory_space<vmem>>, %arg5: memref<1x128xf32, #tpu.memory_space<vmem>>, %arg6: memref<256x128xf32, #tpu.memory_space<vmem>>, %arg7: memref<1x128xf32, #tpu.memory_space<vmem>>, %arg8: memref<1x16x128xf32, #tpu.memory_space<vmem>>) attributes {dimension_semantics = [#tpu.dimension_semantics<parallel>], iteration_bounds = array<i64: 4>, scalar_prefetch = 0 : i64, scratch_operands = 0 : i64, tpu.core_type = #tpu.core_type<tc>, window_params = [{transform_indices = @transform_0, window_bounds = array<i64: 1, 16, 128>}, {transform_indices = @transform_1, window_bounds = array<i64: 1, 32, 16>}, {transform_indices = @transform_2, window_bounds = array<i64: 1, 32, 16>}, {pipeline_mode = #tpu.pipeline_mode<synchronous>, transform_indices = @transform_3, window_bounds = array<i64: 128, 128>}, {pipeline_mode = #tpu.pipeline_mode<synchronous>, transform_indices = @transform_4, window_bounds = array<i64: 1, 128>}, {pipeline_mode = #tpu.pipeline_mode<synchronous>, transform_indices = @transform_5, window_bounds = array<i64: 256, 128>}, {pipeline_mode = #tpu.pipeline_mode<synchronous>, transform_indices = @transform_6, window_bounds = array<i64: 1, 128>}, {transform_indices = @transform_7, window_bounds = array<i64: 1, 16, 128>}]} {
    %c0 = arith.constant 0 : index
    %c0_0 = arith.constant 0 : index
    %c0_1 = arith.constant 0 : index
    %0 = vector.load %arg1[%c0, %c0_0, %c0_1] : memref<1x16x128xf32, #tpu.memory_space<vmem>>, vector<1x16x128xf32>
    %1 = vector.shape_cast %0 : vector<1x16x128xf32> to vector<16x128xf32>
    %c0_2 = arith.constant 0 : index
    %c0_3 = arith.constant 0 : index
    %c0_4 = arith.constant 0 : index
    %2 = vector.load %arg2[%c0_2, %c0_3, %c0_4] : memref<1x32x16xbf16, #tpu.memory_space<vmem>>, vector<1x32x16xbf16>
    %3 = vector.shape_cast %2 : vector<1x32x16xbf16> to vector<32x16xbf16>
    %4 = arith.extf %3 : vector<32x16xbf16> to vector<32x16xf32>
    %c0_5 = arith.constant 0 : index
    %c0_6 = arith.constant 0 : index
    %c0_7 = arith.constant 0 : index
    %5 = vector.load %arg3[%c0_5, %c0_6, %c0_7] : memref<1x32x16xbf16, #tpu.memory_space<vmem>>, vector<1x32x16xbf16>
    %6 = vector.shape_cast %5 : vector<1x32x16xbf16> to vector<32x16xbf16>
    %7 = arith.extf %6 : vector<32x16xbf16> to vector<32x16xf32>
    %c0_8 = arith.constant 0 : index
    %c0_9 = arith.constant 0 : index
    %8 = vector.load %arg4[%c0_8, %c0_9] : memref<128x128xf32, #tpu.memory_space<vmem>>, vector<128x128xf32>
    %c0_10 = arith.constant 0 : index
    %c0_11 = arith.constant 0 : index
    %9 = vector.load %arg6[%c0_10, %c0_11] : memref<256x128xf32, #tpu.memory_space<vmem>>, vector<256x128xf32>
    %c0_12 = arith.constant 0 : index
    %c0_13 = arith.constant 0 : index
    %10 = vector.load %arg5[%c0_12, %c0_13] : memref<1x128xf32, #tpu.memory_space<vmem>>, vector<1x128xf32>
    %11 = vector.shape_cast %10 : vector<1x128xf32> to vector<1x128xf32>
    %12 = vector.broadcast %11 : vector<1x128xf32> to vector<32x128xf32>
    %c0_14 = arith.constant 0 : index
    %c0_15 = arith.constant 0 : index
    %13 = vector.load %arg7[%c0_14, %c0_15] : memref<1x128xf32, #tpu.memory_space<vmem>>, vector<1x128xf32>
    %14 = vector.shape_cast %13 : vector<1x128xf32> to vector<1x128xf32>
    %15 = vector.broadcast %14 : vector<1x128xf32> to vector<16x128xf32>
    %cst = arith.constant dense<0.000000e+00> : vector<16x128xf32>
    %16 = tpu.matmul %1, %8, %cst {dimension_numbers = #tpu.dot_dimension_numbers<[1], [0], [0], [1], [0, 0, 1, 1], [], []>} : vector<16x128xf32>, vector<128x128xf32>, vector<16x128xf32> -> vector<16x128xf32>
    %cst_16 = arith.constant dense<0.000000e+00> : vector<32x128xf32>
    %17 = tpu.matmul %4, %16, %cst_16 {dimension_numbers = #tpu.dot_dimension_numbers<[1], [0], [0], [1], [0, 0, 1, 1], [], []>} : vector<32x16xf32>, vector<16x128xf32>, vector<32x128xf32> -> vector<32x128xf32>
    %18 = arith.addf %17, %12 : vector<32x128xf32>
    %cst_17 = arith.constant 0.000000e+00 : f32
    %19 = vector.broadcast %cst_17 : f32 to vector<32x128xf32>
    %20 = arith.maximumf %18, %19 : vector<32x128xf32>
    %cst_18 = arith.constant dense<0.000000e+00> : vector<16x128xf32>
    %21 = tpu.matmul %7, %20, %cst_18 {dimension_numbers = #tpu.dot_dimension_numbers<[0], [0], [1], [1], [0, 1, 1, 1], [], []>} : vector<32x16xf32>, vector<32x128xf32>, vector<16x128xf32> -> vector<16x128xf32>
    %22 = tpu.concatenate %21, %1 in 1 : vector<16x128xf32>, vector<16x128xf32> -> vector<16x256xf32>
    %cst_19 = arith.constant dense<0.000000e+00> : vector<16x128xf32>
    %23 = tpu.matmul %22, %9, %cst_19 {dimension_numbers = #tpu.dot_dimension_numbers<[1], [0], [0], [1], [0, 0, 1, 1], [], []>} : vector<16x256xf32>, vector<256x128xf32>, vector<16x128xf32> -> vector<16x128xf32>
    %24 = arith.addf %23, %15 : vector<16x128xf32>
    %cst_20 = arith.constant 0.000000e+00 : f32
    %25 = vector.broadcast %cst_20 : f32 to vector<16x128xf32>
    %26 = arith.maximumf %24, %25 : vector<16x128xf32>
    %cst_21 = arith.constant dense<0.000000e+00> : vector<16x128xf32>
    %27 = tpu.matmul %26, %8, %cst_21 {dimension_numbers = #tpu.dot_dimension_numbers<[1], [0], [0], [1], [0, 0, 1, 1], [], []>} : vector<16x128xf32>, vector<128x128xf32>, vector<16x128xf32> -> vector<16x128xf32>
    %cst_22 = arith.constant dense<0.000000e+00> : vector<32x128xf32>
    %28 = tpu.matmul %4, %27, %cst_22 {dimension_numbers = #tpu.dot_dimension_numbers<[1], [0], [0], [1], [0, 0, 1, 1], [], []>} : vector<32x16xf32>, vector<16x128xf32>, vector<32x128xf32> -> vector<32x128xf32>
    %29 = arith.addf %28, %12 : vector<32x128xf32>
    %cst_23 = arith.constant 0.000000e+00 : f32
    %30 = vector.broadcast %cst_23 : f32 to vector<32x128xf32>
    %31 = arith.maximumf %29, %30 : vector<32x128xf32>
    %cst_24 = arith.constant dense<0.000000e+00> : vector<16x128xf32>
    %32 = tpu.matmul %7, %31, %cst_24 {dimension_numbers = #tpu.dot_dimension_numbers<[0], [0], [1], [1], [0, 1, 1, 1], [], []>} : vector<32x16xf32>, vector<32x128xf32>, vector<16x128xf32> -> vector<16x128xf32>
    %33 = tpu.concatenate %32, %26 in 1 : vector<16x128xf32>, vector<16x128xf32> -> vector<16x256xf32>
    %cst_25 = arith.constant dense<0.000000e+00> : vector<16x128xf32>
    %34 = tpu.matmul %33, %9, %cst_25 {dimension_numbers = #tpu.dot_dimension_numbers<[1], [0], [0], [1], [0, 0, 1, 1], [], []>} : vector<16x256xf32>, vector<256x128xf32>, vector<16x128xf32> -> vector<16x128xf32>
    %35 = arith.addf %34, %15 : vector<16x128xf32>
    %cst_26 = arith.constant 0.000000e+00 : f32
    %36 = vector.broadcast %cst_26 : f32 to vector<16x128xf32>
    %37 = arith.maximumf %35, %36 : vector<16x128xf32>
    %cst_27 = arith.constant dense<0.000000e+00> : vector<16x128xf32>
    %38 = tpu.matmul %37, %8, %cst_27 {dimension_numbers = #tpu.dot_dimension_numbers<[1], [0], [0], [1], [0, 0, 1, 1], [], []>} : vector<16x128xf32>, vector<128x128xf32>, vector<16x128xf32> -> vector<16x128xf32>
    %cst_28 = arith.constant dense<0.000000e+00> : vector<32x128xf32>
    %39 = tpu.matmul %4, %38, %cst_28 {dimension_numbers = #tpu.dot_dimension_numbers<[1], [0], [0], [1], [0, 0, 1, 1], [], []>} : vector<32x16xf32>, vector<16x128xf32>, vector<32x128xf32> -> vector<32x128xf32>
    %40 = arith.addf %39, %12 : vector<32x128xf32>
    %cst_29 = arith.constant 0.000000e+00 : f32
    %41 = vector.broadcast %cst_29 : f32 to vector<32x128xf32>
    %42 = arith.maximumf %40, %41 : vector<32x128xf32>
    %cst_30 = arith.constant dense<0.000000e+00> : vector<16x128xf32>
    %43 = tpu.matmul %7, %42, %cst_30 {dimension_numbers = #tpu.dot_dimension_numbers<[0], [0], [1], [1], [0, 1, 1, 1], [], []>} : vector<32x16xf32>, vector<32x128xf32>, vector<16x128xf32> -> vector<16x128xf32>
    %44 = tpu.concatenate %43, %37 in 1 : vector<16x128xf32>, vector<16x128xf32> -> vector<16x256xf32>
    %cst_31 = arith.constant dense<0.000000e+00> : vector<16x128xf32>
    %45 = tpu.matmul %44, %9, %cst_31 {dimension_numbers = #tpu.dot_dimension_numbers<[1], [0], [0], [1], [0, 0, 1, 1], [], []>} : vector<16x256xf32>, vector<256x128xf32>, vector<16x128xf32> -> vector<16x128xf32>
    %46 = arith.addf %45, %15 : vector<16x128xf32>
    %cst_32 = arith.constant 0.000000e+00 : f32
    %47 = vector.broadcast %cst_32 : f32 to vector<16x128xf32>
    %48 = arith.maximumf %46, %47 : vector<16x128xf32>
    %c0_33 = arith.constant 0 : index
    %c0_34 = arith.constant 0 : index
    %c0_35 = arith.constant 0 : index
    %49 = vector.load %arg8[%c0_33, %c0_34, %c0_35] : memref<1x16x128xf32, #tpu.memory_space<vmem>>, vector<1x16x128xf32>
    %50 = vector.shape_cast %49 : vector<1x16x128xf32> to vector<16x128xf32>
    %51 = vector.shape_cast %48 : vector<16x128xf32> to vector<1x16x128xf32>
    tpu.vector_store %arg8[%c0_33, %c0_34, %c0_35], %51 {strides = array<i32>} : memref<1x16x128xf32, #tpu.memory_space<vmem>>, vector<1x16x128xf32>,
    return
  }
  func.func @transform_0(%arg0: i32) -> (i32, i32, i32) {
    %c0_i32 = arith.constant 0 : i32
    %c0_i32_0 = arith.constant 0 : i32
    %c0_i32_1 = arith.constant 0 : i32
    return %arg0, %c0_i32, %c0_i32_0 : i32, i32, i32
  }
  func.func @transform_1(%arg0: i32) -> (i32, i32, i32) {
    %c0_i32 = arith.constant 0 : i32
    %c0_i32_0 = arith.constant 0 : i32
    %c0_i32_1 = arith.constant 0 : i32
    return %arg0, %c0_i32, %c0_i32_0 : i32, i32, i32
  }
  func.func @transform_2(%arg0: i32) -> (i32, i32, i32) {
    %c0_i32 = arith.constant 0 : i32
    %c0_i32_0 = arith.constant 0 : i32
    %c0_i32_1 = arith.constant 0 : i32
    return %arg0, %c0_i32, %c0_i32_0 : i32, i32, i32
  }
  func.func @transform_3(%arg0: i32) -> (i32, i32) {
    %c0_i32 = arith.constant 0 : i32
    %c0_i32_0 = arith.constant 0 : i32
    %c0_i32_1 = arith.constant 0 : i32
    return %c0_i32, %c0_i32_0 : i32, i32
  }
  func.func @transform_4(%arg0: i32) -> (i32, i32) {
    %c0_i32 = arith.constant 0 : i32
    %c0_i32_0 = arith.constant 0 : i32
    %c0_i32_1 = arith.constant 0 : i32
    return %c0_i32, %c0_i32_0 : i32, i32
  }
  func.func @transform_5(%arg0: i32) -> (i32, i32) {
    %c0_i32 = arith.constant 0 : i32
    %c0_i32_0 = arith.constant 0 : i32
    %c0_i32_1 = arith.constant 0 : i32
    return %c0_i32, %c0_i32_0 : i32, i32
  }
  func.func @transform_6(%arg0: i32) -> (i32, i32) {
    %c0_i32 = arith.constant 0 : i32
    %c0_i32_0 = arith.constant 0 : i32
    %c0_i32_1 = arith.constant 0 : i32
    return %c0_i32, %c0_i32_0 : i32, i32
  }
  func.func @transform_7(%arg0: i32) -> (i32, i32, i32) {
    %c0_i32 = arith.constant 0 : i32
    %c0_i32_0 = arith.constant 0 : i32
    %c0_i32_1 = arith.constant 0 : i32
    return %arg0, %c0_i32, %c0_i32_0 : i32, i32, i32
  }
}

</mosaic_0001>

<bundles_post_ra>
// kernel: tpu_custom_call.1
= control target key start
LH: loop header
LB: loop body
LE: loop exit
PB: predicated region body
PF: predicated region fallthrough
CT: control target
= control target key end

     0   :  { %12 = vsyncpa [#allocation3], 0  ;;  %s2716_s0 = inlined_call_operand.vmem [shape: f32[4,16,128], index: 0, kind: input, shape index: {}]   ;;  %s2717_s1 = inlined_call_operand.vmem [shape: bf16[4,32,16], index: 1, kind: input, shape index: {}]   ;;  %s2718_s2 = inlined_call_operand.vmem [shape: bf16[4,32,16], index: 2, kind: input, shape index: {}]   ;;  %s2719_s3 = inlined_call_operand.vmem [shape: f32[128,128], index: 3, kind: input, shape index: {}]   ;;  %s2720_s4 = inlined_call_operand.vmem [shape: f32[1,128], index: 4, kind: input, shape index: {}]   ;;  %s2721_s5 = inlined_call_operand.hbm [shape: f32[256,128], index: 5, kind: input, shape index: {}]   ;;  %s2722_s6 = inlined_call_operand.vmem [shape: f32[1,128], index: 6, kind: input, shape index: {}]   ;;  %s2723_s7 = inlined_call_operand.hbm [shape: f32[4,16,128], index: 7, kind: output, shape index: {}]  }
   0x1   :  { %13 = vsyncpa [#allocation4], 0 }
   0x2   :  { %15 = vsyncpa [#allocation4 + $0x1], 0  ;;  %s2151_s24 = smov 0   ;;  %s2153_s25 = smov 0  }
   0x3   :  { %s2155_s26 = smov 0   ;;  %s2157_s27 = smov 0  }
   0x4 LB: > { %s2172_s28 = sadd.s32 4294967295, %s2103_s27   ;;  %s1526_s29 = sadd.s32 4294967294, %s2103_s27   ;;  %s2103_s27 = sphi %s2157_s27, %s2735_s27   ;;  %s2099_s26 = sphi %s2155_s26, %s2734_s26   ;;  %s2095_s25 = sphi %s2153_s25, %s2733_s25   ;;  %s2091_s24 = sphi %s2151_s24, %s2732_s24  }
   0x5   : > { %s2176_s30 = sadd.s32 1, %s2103_s27   ;;  %s190_s8 = sadd.s32 1, %s2099_s26 }
   0x6   : > { %s187_s9 = ssub.s32 %s2103_s27, %s2176_s30  ;;  %p200_p0 = scmp.ne.s32.totalorder %s2099_s26, %s2095_s25 }
   0x7   : > { %p188_p1 = scmp.eq.s32.totalorder %s187_s9, 0  ;;  %p201_p2 = scmp.eq.s32.totalorder %s2172_s28, 3 }
   0x8   : > { %p206_p3 = scmp.ne.s32.totalorder %s2095_s25, %s2091_s24  ;;  %p207_p4 = scmp.eq.s32.totalorder %s1526_s29, 3 }
   0x9   : > { %s2187_s10 = scalar_select %p188_p1, %s2099_s26, %s190_s8  }
   0xa   : > { %p2189_p5 = por %p201_p2, %p200_p0  ;;  %p2193_p6 = por %p207_p4, %p206_p3 }
   0xb   : > { %p1527_p7 = scmp.ge.s32.totalorder %s2103_s27, 1  ;;  %p214_p8 = scmp.lt.s32.totalorder %s2103_s27, 5 }
   0xc   : > { %s2727_s12 = scalar_select %p2193_p6, 1, 0 }
   0xd   : > { %p1972_p9 = scmp.eq.s32.totalorder %s2172_s28, 0  ;;  %p2200_p10 = pnand %p1527_p7, %p214_p8 }
   0xe   : > { %s2105_s14 = smov [#allocation2]  }
   0xf   : > { %s232_s15 = sshll.u32 %s2105_s14, 4  ;;  %p1964_p11 = pneg %p2200_p10  ;;  %s233_s15 = int_to_ptr.vmem [resolvable:$true] %s232_s15 }
  0x10   : > { %s2024_s16 = scalar_lea.vmem %s233_s15, 4096  ;;  %p2032_p3 = scmp.lt.s32.totalorder %s233_s15, %s233_s15 }
  0x11   : > { %p1965_p12 = pnand %p1972_p9, %p1964_p11  ;;  %p2025_p0 = scmp.ne.s32.totalorder %s233_s15, %s2024_s16 }
  0x12   : > { %p2033_p4 = scmp.lt.s32.totalorder %s2024_s16, %s2024_s16 }
  0x13   : > { %p2015_p13 = pneg %p1965_p12 }
  0x14   : > { %p2034_p6 = por %p2033_p4, %p2032_p3 }
  0x15   : > { %p2027_p1 = pnand %p2025_p0, %p2015_p13 }
  0x17   : > { %p2028_p2 = pneg %p2027_p1 }
  0x19   : > { %p2035_p7 = pnand %p2034_p6, %p2028_p2 }
  0x1b   : > { %2038 = shalt.err (!%p2035_p7)
}
  0x1c   : > { %s2106_s17 = smov 128   ;;  %s2107_s18 = smov 8  }
  0x1d   : > { %1967 = dma.hbm_to_vmem [thread:$0]  (!%p1965_p12), %s2721_s5, 4096, %s233_s15, [#allocation3], %s2106_s17, %s2106_s17, %s2107_s18  }
  0x1e   : > { %275 = sbr.rel (%p2200_p10) target bundleno = 2501 (0x9c5), region = 48 }
  0x23   : > { %2082 = dma.done.wait (%p1972_p9), [#allocation3], 4096  }
  0x24   : > { %2084 = vsyncadd (%p1972_p9), [#allocation3], 4294963200  ;;  %p317_p8 = scmp.lt.s32.totalorder %s2172_s28, 3  ;;  %v2224_v0 = vld [vmem:[%s2719_s3 + $0x78] sm:$0xff]  ;;  %v2229_v1 = vld [vmem:[%s2719_s3 + $0x70] sm:$0xff]  ;;  %vm487_vm0 = vcmask 130048  }
  0x25   : > { %1790 = vmatprep.subr.mxu0 %v2224_v0  ;;  %v2236_v2 = vld [vmem:[%s2719_s3 + $0x68] sm:$0xff]  ;;  %v2249_v3 = vld [vmem:[%s2719_s3 + $0x60] sm:$0xff]  ;;  %v2257_v5 = vld [vmem:[%s2719_s3 + $0x58] sm:$0xff]  ;;  %vm621_vm1 = vcmask 261120   ;;  %s314_s15 = sand.u32 1, %s2095_s25   ;;  %s1567_s20 = sshll.u32 %s2172_s28, 8 }
  0x26   : > { %s318_s21 = scalar_select %p317_p8, %s2172_s28, 3  ;;  %1791 = vmatpush3.msra.mxu0 %v2224_v0  ;;  %v2264_v6 = vld [vmem:[%s2719_s3 + $0x50] sm:$0xff]  ;;  %v2271_v7 = vld [vmem:[%s2719_s3 + $0x48] sm:$0xff]  ;;  %v2278_v8 = vld [vmem:[%s2719_s3 + $0x40] sm:$0xff] }
  0x27   : > { %1792 = vmatprep.subr.mxu0 %v2229_v1  ;;  %v2285_v9 = vld [vmem:[%s2719_s3 + $0x38] sm:$0xff]  ;;  %v2292_v10 = vld [vmem:[%s2719_s3 + $0x30] sm:$0xff]  ;;  %v2299_v11 = vld [vmem:[%s2719_s3 + $0x28] sm:$0xff]  ;;  %s1532_s16 = sshll.u32 %s314_s15, 4  ;;  %s2674_s29 = scalar_lea.hbm %s2723_s7, %s1567_s20 }
  0x28   : > { %s2219_s22 = sshll.u32 %s318_s21, 4  ;;  %1793 = vmatpush3.msra.mxu0 %v2229_v1  ;;  %v2306_v12 = vld [vmem:[%s2719_s3 + $0x20] sm:$0xff]  ;;  %v2313_v13 = vld [vmem:[%s2719_s3 + $0x18] sm:$0xff]  ;;  %v2320_v14 = vld [vmem:[%s2719_s3 + $0x10] sm:$0xff]  ;;  %s316_s18 = scalar_lea.vmem [#allocation5], %s1532_s16 }
  0x29   : > { %s2242_s17 = scalar_lea.vmem %s2716_s0, %s2219_s22  ;;  %1794 = vmatprep.subr.mxu0 %v2236_v2  ;;  %v2327_v15 = vld [vmem:[%s2719_s3 + $0x8] sm:$0xff]  ;;  %v2334_v16 = vld [vmem:[%s2719_s3] sm:$0xff]  ;;  %s326_s23 = scalar_lea.vmem %s2717_s1, %s2219_s22  ;;  %v2372_v33 = vld [vmem:[#allocation2 + $0xf8] sm:$0xff] }
  0x2a   : > { %v332_v4 = vld [vmem:[%s2242_s17] sm:$0xff]  ;;  %1795 = vmatpush3.msra.mxu0 %v2236_v2  ;;  %v2339_v17 = vld [vmem:[%s2242_s17 + $0x8] sm:$0xff]  ;;  %s331_s8 = scalar_lea.vmem %s2718_s2, %s2219_s22  ;;  %v2374_v34 = vld [vmem:[#allocation2 + $0x78] sm:$0xff]  ;;  %1616 = vmatprep.subr.mxu1 %v2372_v33  ;;  %s1428_s19 = sshll.u32 %s316_s18, 4  ;;  %s2669_s19 = int_to_ptr.vmem [resolvable:$true] %s1428_s19 }
  0x2b   : > { %1822 = vmatprep.mubr.f32.mxu0 %v332_v4  ;;  %1796 = vmatprep.subr.mxu0 %v2249_v3  ;;  %v1569_v18 = vld [vmem:[%s326_s23] sm:$0xff]   ;;  %v1585_v23 = vld [vmem:[%s331_s8 + $0x8] sm:$0xff]   ;;  %v2376_v35 = vld [vmem:[#allocation2 + $0xf0] sm:$0xff]  ;;  %s2676_s17 = scalar_lea.sflag [#allocation4], %s314_s15  ;;  %s2108_s28 = smov [#allocation5]  }
  0x2c   : > { %767 = vmatprep.mubr.f32.mxu1 %v332_v4  ;;  %1797 = vmatpush3.msra.mxu0 %v2249_v3  ;;  %v2348_v19 = vunpack.c.l.bf16 %v1569_v18  ;;  %v1577_v20 = vld [vmem:[%s331_s8] sm:$0xff]   ;;  %v1582_v24 = vunpack.c.l.bf16 %v1585_v23  ;;  %v1583_v25 = vunpack.c.h.bf16 %v1585_v23  ;;  %v1584_v26 = vld [vmem:[%s326_s23 + $0x8] sm:$0xff]   ;;  %v2356_v28 = vunpack.c.h.bf16 %v1569_v18  ;;  %v2379_v36 = vld [vmem:[#allocation2 + $0x70] sm:$0xff]  ;;  %s2039_s8 = scalar_lea.vmem %s2669_s19, 256  ;;  %s2043_s22 = sshll.u32 %s2108_s28, 4  ;;  %s2044_s22 = int_to_ptr.vmem [resolvable:$false] %s2043_s22 }
  0x2d   : > { %1798 = vmatprep.subr.mxu0 %v2257_v5  ;;  %v1578_v21 = vunpack.c.l.bf16 %v1577_v20  ;;  %v1579_v22 = vunpack.c.h.bf16 %v1577_v20  ;;  %v2358_v30 = vunpack.c.l.bf16 %v1584_v26  ;;  %v2362_v31 = vunpack.c.h.bf16 %v1584_v26  ;;  %1617 = vmatpush3.msra.mxu1 %v2374_v34  ;;  %v2382_v37 = vld [vmem:[#allocation2 + $0xe8] sm:$0xff]  ;;  %v2388_v39 = vld [vmem:[#allocation2 + $0xe0] sm:$0xff]  ;;  %v2394_v41 = vld [vmem:[#allocation2 + $0xd8] sm:$0xff]  ;;  %p2040_p6 = scmp.ne.s32.totalorder %s2669_s19, %s2039_s8  ;;  %s2045_s9 = scalar_lea.vmem %s2044_s22, 512 }
  0x2e   : > { %1799 = vmatpush3.msra.mxu0 %v2257_v5  ;;  %1618 = vmatprep.subr.mxu1 %v2376_v35  ;;  %v2385_v38 = vld [vmem:[#allocation2 + $0x68] sm:$0xff]  ;;  %v2391_v40 = vld [vmem:[#allocation2 + $0x60] sm:$0xff]  ;;  %v2397_v42 = vld [vmem:[#allocation2 + $0x58] sm:$0xff]  ;;  %p2046_p11 = scmp.lt.s32.totalorder %s2669_s19, %s2044_s22  ;;  %p2047_p12 = scmp.lt.s32.totalorder %s2045_s9, %s2039_s8 }
  0x2f   : > { %1800 = vmatprep.subr.mxu0 %v2264_v6  ;;  %589 = vxpose.xlu0.b32.start [1/4] (short) (narrow) %v1578_v21, 16  ;;  %v2400_v43 = vld [vmem:[#allocation2 + $0xd0] sm:$0xff]  ;;  %v2406_v45 = vld [vmem:[#allocation2 + $0xc8] sm:$0xff]  ;;  %v2412_v47 = vld [vmem:[#allocation2 + $0xc0] sm:$0xff]  ;;  %p2041_p9 = pnand %p2040_p6, %p2189_p5 }
  0x30   : > { %1801 = vmatpush3.msra.mxu0 %v2264_v6  ;;  %1619 = vmatpush3.msra.mxu1 %v2379_v36  ;;  %v2403_v44 = vld [vmem:[#allocation2 + $0x50] sm:$0xff]  ;;  %v2409_v46 = vld [vmem:[#allocation2 + $0x48] sm:$0xff]  ;;  %v2415_v48 = vld [vmem:[#allocation2 + $0x40] sm:$0xff]  ;;  %p2048_p13 = por %p2047_p12, %p2046_p11 }
  0x31   : > { %1802 = vmatprep.subr.mxu0 %v2271_v7  ;;  %1620 = vmatprep.subr.mxu1 %v2382_v37  ;;  %v2418_v49 = vld [vmem:[#allocation2 + $0xb8] sm:$0xff]  ;;  %v2424_v51 = vld [vmem:[#allocation2 + $0xb0] sm:$0xff]  ;;  %v2430_v53 = vld [vmem:[#allocation2 + $0xa8] sm:$0xff]  ;;  %p2042_p10 = pneg %p2041_p9 }
  0x32   : > { %1803 = vmatpush3.msra.mxu0 %v2271_v7  ;;  %1621 = vmatpush3.msra.mxu1 %v2385_v38  ;;  %v2421_v50 = vld [vmem:[#allocation2 + $0x38] sm:$0xff]  ;;  %v2427_v52 = vld [vmem:[#allocation2 + $0x30] sm:$0xff]  ;;  %v2433_v54 = vld [vmem:[#allocation2 + $0x28] sm:$0xff] }
  0x33   : > { %1804 = vmatprep.subr.mxu0 %v2278_v8  ;;  %590 = vxpose.xlu0.b32.cont [2/4] (short) (narrow) %v1579_v22, 16  ;;  %v2436_v55 = vld [vmem:[#allocation2 + $0xa0] sm:$0xff]  ;;  %v2442_v57 = vld [vmem:[#allocation2 + $0x98] sm:$0xff]  ;;  %v2448_v59 = vld [vmem:[#allocation2 + $0x90] sm:$0xff]  ;;  %p2049_p0 = pnand %p2048_p13, %p2042_p10 }
  0x34   : > { %1805 = vmatpush3.msra.mxu0 %v2278_v8  ;;  %1622 = vmatprep.subr.mxu1 %v2388_v39  ;;  %v2439_v56 = vld [vmem:[#allocation2 + $0x20] sm:$0xff]  ;;  %v2445_v58 = vld [vmem:[#allocation2 + $0x18] sm:$0xff]  ;;  %v2451_v60 = vld [vmem:[#allocation2 + $0x10] sm:$0xff] }
  0x35   : > { %1806 = vmatprep.subr.mxu0 %v2285_v9  ;;  %1623 = vmatpush3.msra.mxu1 %v2391_v40  ;;  %v2454_v61 = vld [vmem:[#allocation2 + $0x88] sm:$0xff]  ;;  %v2462_v4 = vld [vmem:[%s2720_s4] ss:$0 sm:$0xff] }
  0x36   : > { %1807 = vmatpush3.msra.mxu0 %v2285_v9  ;;  %1624 = vmatprep.subr.mxu1 %v2394_v41  ;;  %2729 = vst [vmem:[#allocation8_spill] sm:$0xff] %v2454_v61 }
  0x37   : > { %1808 = vmatprep.subr.mxu0 %v2292_v10  ;;  %591 = vxpose.xlu0.b32.cont [3/4] (short) (narrow) %v1582_v24, 16 }
  0x38   : > { %1809 = vmatpush3.msra.mxu0 %v2292_v10  ;;  %1625 = vmatpush3.msra.mxu1 %v2397_v42 }
  0x39   : > { %1810 = vmatprep.subr.mxu0 %v2299_v11  ;;  %1626 = vmatprep.subr.mxu1 %v2400_v43 }
  0x3a   : > { %1811 = vmatpush3.msra.mxu0 %v2299_v11  ;;  %1627 = vmatpush3.msra.mxu1 %v2403_v44 }
  0x3b   : > { %1812 = vmatprep.subr.mxu0 %v2306_v12  ;;  %592 = vxpose.xlu0.b32.end [4/4] (short) (narrow) %v1583_v25, 16 }
  0x3c   : > { %1813 = vmatpush3.msra.mxu0 %v2306_v12  ;;  %1628 = vmatprep.subr.mxu1 %v2406_v45 }
  0x3d   : > { %1814 = vmatprep.subr.mxu0 %v2313_v13  ;;  %1629 = vmatpush3.msra.mxu1 %v2409_v46 }
  0x3e   : > { %1815 = vmatpush3.msra.mxu0 %v2313_v13  ;;  %1630 = vmatprep.subr.mxu1 %v2412_v47 }
  0x3f   : > { %1816 = vmatprep.subr.mxu0 %v2320_v14  ;;  %1631 = vmatpush3.msra.mxu1 %v2415_v48 }
  0x40   : > { %1817 = vmatpush3.msra.mxu0 %v2320_v14  ;;  %1632 = vmatprep.subr.mxu1 %v2418_v49 }
  0x41   : > { %1818 = vmatprep.subr.mxu0 %v2327_v15  ;;  %1633 = vmatpush3.msra.mxu1 %v2421_v50 }
  0x42   : > { %1819 = vmatpush3.msra.mxu0 %v2327_v15  ;;  %1634 = vmatprep.subr.mxu1 %v2424_v51 }
  0x43   : > { %1820 = vmatprep.subr.mxu0 %v2334_v16  ;;  %1635 = vmatpush3.msra.mxu1 %v2427_v52 }
  0x44   : > { %1821 = vmatpush3.msra.mxu0 %v2334_v16  ;;  %1636 = vmatprep.subr.mxu1 %v2430_v53 }
  0x45   : > { %1823 = vmatmul.mubr.f32.vlgmr.msra.gmra.mxu0 %v2339_v17  ;;  %1637 = vmatpush3.msra.mxu1 %v2433_v54 }
  0x46   : > { %1829 = vmatprep.mubr.msk.f32.mxu0 %vm487_vm0, %v2348_v19  ;;  %1638 = vmatprep.subr.mxu1 %v2436_v55 }
  0x47   : > { %1639 = vmatpush3.msra.mxu1 %v2439_v56 }
  0x48   : > { %1640 = vmatprep.subr.mxu1 %v2442_v57 }
  0x49   : > { %1641 = vmatpush3.msra.mxu1 %v2445_v58 }
  0x4a   : > { %1642 = vmatprep.subr.mxu1 %v2448_v59 }
  0x4b   : > { %1643 = vmatpush3.msra.mxu1 %v2451_v60 }
  0x4c   : > { %1644 = vmatprep.subr.mxu1 %v2454_v61 }
  0xab   : > { %v2368_v32 = vpop.trf.xlu0 }
  0xaf   : > { %v2468_v61 = vpop.trf.xlu0 }
 0x105   : > { %v1824_v27 = vpop.f32.mrf.mxu0 }
 0x106   : > { %1825 = vmatprep.subr.mxu0 %v1824_v27 }
 0x107   : > { %v478_v29 = vpop.f32.mrf.mxu0  ;;  %1826 = vmatpush3.msra.mxu0 %v1824_v27 }
 0x108   : > { %1827 = vmatprep.subr.mxu0 %v478_v29 }
 0x109   : > { %1828 = vmatpush3.msra.mxu0 %v478_v29 }
 0x10a   : > { %1830 = vmatmul.mubr.msk.f32.vlgmr.msra.gmra.mxu0 %vm487_vm0, %v2356_v28 }
 0x10b   : > { %1832 = vmatprep.mubr.msk.f32.mxu0 %vm487_vm0, %v2358_v30 }
 0x10e   : > { %1833 = vmatmul.mubr.msk.f32.gmra.mxu0 %vm487_vm0, %v2362_v31 }
 0x10f   : > { %1843 = vmatprep.mubr.msk.f32.mxu0 %vm621_vm1, %v2368_v32 }
 0x1ca   : > { %v1831_v62 = vpop.f32.mrf.mxu0 }
 0x1cb   : > { %v572_v22 = vadd.f32 %v1831_v62, %v2462_v4  ;;  %v2504_v62 = vld [vmem:[#allocation2 + $0x8] sm:$0xff] }
 0x1cc   : > { %v566_v63 = vpop.f32.mrf.mxu0  ;;  %1645 = vmatpush3.msra.mxu1 %v2504_v62 }
 0x1cd   : > { %v567_v25 = vadd.f32 %v2462_v4, %v566_v63  ;;  %v586_v27 = vmax.f32 %v572_v22, 0.0  ;;  %v2507_v63 = vld [vmem:[#allocation2 + $0x80] sm:$0xff] }
 0x1ce   : > { %v1834_v18 = vpop.f32.mrf.mxu0  ;;  %1646 = vmatprep.subr.mxu1 %v2507_v63 }
 0x1cf   : > { %v582_v20 = vadd.f32 %v1834_v18, %v2462_v4  ;;  %v585_v29 = vmax.f32 %v567_v25, 0.0  ;;  %v2510_v18 = vld [vmem:[#allocation2] sm:$0xff] }
 0x1d0   : > { %v576_v21 = vpop.f32.mrf.mxu0  ;;  %1647 = vmatpush3.msra.mxu1 %v2510_v18 }
 0x1d1   : > { %v588_v23 = vmax.f32 %v582_v20, 0.0  ;;  %v577_v24 = vadd.f32 %v2462_v4, %v576_v21  ;;  %1846 = vmatprep.subr.mxu1 %v2224_v0 }
 0x1d3   : > { %v587_v26 = vmax.f32 %v577_v24, 0.0  ;;  %1835 = vmatprep.subr.mxu0 %v588_v23 }
 0x1d4   : > { %1836 = vmatpush3.msra.mxu0 %v588_v23 }
 0x1d5   : > { %1837 = vmatprep.subr.mxu0 %v587_v26 }
 0x1d6   : > { %1838 = vmatpush3.msra.mxu0 %v587_v26 }
 0x1d7   : > { %1839 = vmatprep.subr.mxu0 %v586_v27 }
 0x1d8   : > { %1840 = vmatpush3.msra.mxu0 %v586_v27 }
 0x1d9   : > { %1841 = vmatprep.subr.mxu0 %v585_v29 }
 0x1da   : > { %1842 = vmatpush3.msra.mxu0 %v585_v29 }
 0x1db   : > { %1844 = vmatmul.mubr.msk.f32.vlgmr.msra.gmra.mxu0 %vm621_vm1, %v2468_v61  ;;  %1902 = vmatprep.subr.mxu0 %v2224_v0 }
 0x1dc   : > { %1903 = vmatpush3.msra.mxu0 %v2224_v0 }
 0x1dd   : > { %1904 = vmatprep.subr.mxu0 %v2229_v1 }
 0x1de   : > { %1905 = vmatpush3.msra.mxu0 %v2229_v1 }
 0x1df   : > { %1906 = vmatprep.subr.mxu0 %v2236_v2 }
 0x1e0   : > { %1907 = vmatpush3.msra.mxu0 %v2236_v2 }
 0x1e1   : > { %1908 = vmatprep.subr.mxu0 %v2249_v3 }
 0x1e2   : > { %1909 = vmatpush3.msra.mxu0 %v2249_v3 }
 0x1e3   : > { %1910 = vmatprep.subr.mxu0 %v2257_v5 }
 0x1e4   : > { %1911 = vmatpush3.msra.mxu0 %v2257_v5 }
 0x1e5   : > { %1912 = vmatprep.subr.mxu0 %v2264_v6 }
 0x1e6   : > { %1913 = vmatpush3.msra.mxu0 %v2264_v6 }
 0x1e7   : > { %1914 = vmatprep.subr.mxu0 %v2271_v7 }
 0x1e8   : > { %1915 = vmatpush3.msra.mxu0 %v2271_v7 }
 0x1e9   : > { %1916 = vmatprep.subr.mxu0 %v2278_v8 }
 0x1ea   : > { %1917 = vmatpush3.msra.mxu0 %v2278_v8 }
 0x1eb   : > { %1918 = vmatprep.subr.mxu0 %v2285_v9 }
 0x1ec   : > { %1919 = vmatpush3.msra.mxu0 %v2285_v9 }
 0x1ed   : > { %1920 = vmatprep.subr.mxu0 %v2292_v10 }
 0x1ee   : > { %1921 = vmatpush3.msra.mxu0 %v2292_v10 }
 0x1ef   : > { %1922 = vmatprep.subr.mxu0 %v2299_v11 }
 0x1f0   : > { %1923 = vmatpush3.msra.mxu0 %v2299_v11 }
 0x1f1   : > { %1924 = vmatprep.subr.mxu0 %v2306_v12 }
 0x1f2   : > { %1925 = vmatpush3.msra.mxu0 %v2306_v12 }
 0x1f3   : > { %1926 = vmatprep.subr.mxu0 %v2313_v13 }
 0x1f4   : > { %1927 = vmatpush3.msra.mxu0 %v2313_v13 }
 0x1f5   : > { %1928 = vmatprep.subr.mxu0 %v2320_v14 }
 0x1f6   : > { %1929 = vmatpush3.msra.mxu0 %v2320_v14 }
 0x1f7   : > { %1930 = vmatprep.subr.mxu0 %v2327_v15 }
 0x1f8   : > { %1931 = vmatpush3.msra.mxu0 %v2327_v15 }
 0x1f9   : > { %1932 = vmatprep.subr.mxu0 %v2334_v16 }
 0x1fa   : > { %1933 = vmatpush3.msra.mxu0 %v2334_v16 }
 0x29b   : > { %v1845_v20 = vpop.f32.mrf.mxu0 }
 0x29d   : > { %v694_v21 = vpop.f32.mrf.mxu0 }
 0x29e   : > { %768 = vmatmul.mubr.f32.vlgmr.msra.gmra.mxu1 %v694_v21  ;;  %v2730_v21 = vld [vmem:[#allocation8_spill] sm:$0xff] }
 0x29f   : > { %772 = vmatprep.mubr.f32.mxu1 %v2339_v17  ;;  %1847 = vmatpush3.msra.mxu1 %v2224_v0 }
 0x2a0   : > { %1848 = vmatprep.subr.mxu1 %v2229_v1 }
 0x2a1   : > { %1849 = vmatpush3.msra.mxu1 %v2229_v1  ;;  %v2549_v1 = vld [vmem:[%s2722_s6] ss:$0 sm:$0xff] }
 0x2a2   : > { %773 = vmatmul.mubr.f32.gmra.mxu1 %v1845_v20  ;;  %1850 = vmatprep.subr.mxu1 %v2236_v2 }
 0x2a3   : > { %1851 = vmatpush3.msra.mxu1 %v2236_v2 }
 0x2a4   : > { %1852 = vmatprep.subr.mxu1 %v2249_v3 }
 0x2a5   : > { %1853 = vmatpush3.msra.mxu1 %v2249_v3 }
 0x2a6   : > { %1854 = vmatprep.subr.mxu1 %v2257_v5 }
 0x2a7   : > { %1855 = vmatpush3.msra.mxu1 %v2257_v5 }
 0x2a8   : > { %1856 = vmatprep.subr.mxu1 %v2264_v6 }
 0x2a9   : > { %1857 = vmatpush3.msra.mxu1 %v2264_v6 }
 0x2aa   : > { %1858 = vmatprep.subr.mxu1 %v2271_v7 }
 0x2ab   : > { %1859 = vmatpush3.msra.mxu1 %v2271_v7 }
 0x2ac   : > { %1860 = vmatprep.subr.mxu1 %v2278_v8 }
 0x2ad   : > { %1861 = vmatpush3.msra.mxu1 %v2278_v8 }
 0x2ae   : > { %1862 = vmatprep.subr.mxu1 %v2285_v9 }
 0x2af   : > { %1863 = vmatpush3.msra.mxu1 %v2285_v9 }
 0x2b0   : > { %1864 = vmatprep.subr.mxu1 %v2292_v10 }
 0x2b1   : > { %1865 = vmatpush3.msra.mxu1 %v2292_v10 }
 0x2b2   : > { %1866 = vmatprep.subr.mxu1 %v2299_v11 }
 0x2b3   : > { %1867 = vmatpush3.msra.mxu1 %v2299_v11 }
 0x2b4   : > { %1868 = vmatprep.subr.mxu1 %v2306_v12 }
 0x2b5   : > { %1869 = vmatpush3.msra.mxu1 %v2306_v12 }
 0x2b6   : > { %1870 = vmatprep.subr.mxu1 %v2313_v13 }
 0x2b7   : > { %1871 = vmatpush3.msra.mxu1 %v2313_v13 }
 0x2b8   : > { %1872 = vmatprep.subr.mxu1 %v2320_v14 }
 0x2b9   : > { %1873 = vmatpush3.msra.mxu1 %v2320_v14 }
 0x2ba   : > { %1874 = vmatprep.subr.mxu1 %v2327_v15 }
 0x2bb   : > { %1875 = vmatpush3.msra.mxu1 %v2327_v15 }
 0x2bc   : > { %1876 = vmatprep.subr.mxu1 %v2334_v16 }
 0x2bd   : > { %1877 = vmatpush3.msra.mxu1 %v2334_v16 }
 0x35e   : > { %v1648_v0 = vpop.f32.mrf.mxu1 }
 0x360   : > { %v1649_v2 = vpop.f32.mrf.mxu1 }
 0x361   : > { %v1650_v3 = vadd.f32 %v1649_v2, %v1648_v0 }
 0x362   : > { %v1651_v5 = vpop.f32.mrf.mxu1 }
 0x363   : > { %v770_v6 = vadd.f32 %v1650_v3, %v2549_v1 }
 0x364   : > { %v1652_v7 = vpop.f32.mrf.mxu1 }
 0x365   : > { %v778_v8 = vmax.f32 %v770_v6, 0.0  ;;  %v1653_v9 = vadd.f32 %v1652_v7, %v1651_v5 }
 0x367   : > { %v2553_v10 = vadd.f32 %v1653_v9, %v2549_v1  ;;  %1878 = vmatprep.mubr.f32.mxu1 %v778_v8 }
 0x369   : > { %v779_v11 = vmax.f32 %v2553_v10, 0.0 }
 0x36b   : > { %1879 = vmatmul.mubr.f32.vlgmr.msra.gmra.mxu1 %v779_v11 }
 0x36c   : > { %1885 = vmatprep.mubr.msk.f32.mxu1 %vm487_vm0, %v2348_v19 }
 0x42b   : > { %v1880_v12 = vpop.f32.mrf.mxu1 }
 0x42c   : > { %1881 = vmatprep.subr.mxu1 %v1880_v12 }
 0x42d   : > { %v846_v13 = vpop.f32.mrf.mxu1  ;;  %1882 = vmatpush3.msra.mxu1 %v1880_v12 }
 0x42e   : > { %1883 = vmatprep.subr.mxu1 %v846_v13 }
 0x42f   : > { %1884 = vmatpush3.msra.mxu1 %v846_v13 }
 0x430   : > { %1886 = vmatmul.mubr.msk.f32.vlgmr.msra.gmra.mxu1 %vm487_vm0, %v2356_v28 }
 0x431   : > { %1888 = vmatprep.mubr.msk.f32.mxu1 %vm487_vm0, %v2358_v30 }
 0x434   : > { %1889 = vmatmul.mubr.msk.f32.gmra.mxu1 %vm487_vm0, %v2362_v31 }
 0x435   : > { %1899 = vmatprep.mubr.msk.f32.mxu1 %vm621_vm1, %v2368_v32 }
 0x4f0   : > { %v1887_v14 = vpop.f32.mrf.mxu1 }
 0x4f1   : > { %v927_v23 = vadd.f32 %v1887_v14, %v2462_v4 }
 0x4f2   : > { %v921_v15 = vpop.f32.mrf.mxu1 }
 0x4f3   : > { %v922_v26 = vadd.f32 %v2462_v4, %v921_v15  ;;  %v941_v29 = vmax.f32 %v927_v23, 0.0 }
 0x4f4   : > { %v1890_v16 = vpop.f32.mrf.mxu1 }
 0x4f5   : > { %v937_v17 = vadd.f32 %v1890_v16, %v2462_v4  ;;  %v940_v20 = vmax.f32 %v922_v26, 0.0 }
 0x4f6   : > { %v931_v22 = vpop.f32.mrf.mxu1 }
 0x4f7   : > { %v943_v24 = vmax.f32 %v937_v17, 0.0  ;;  %v932_v25 = vadd.f32 %v2462_v4, %v931_v22 }
 0x4f9   : > { %v942_v27 = vmax.f32 %v932_v25, 0.0  ;;  %1891 = vmatprep.subr.mxu1 %v943_v24 }
 0x4fa   : > { %1892 = vmatpush3.msra.mxu1 %v943_v24 }
 0x4fb   : > { %1893 = vmatprep.subr.mxu1 %v942_v27 }
 0x4fc   : > { %1894 = vmatpush3.msra.mxu1 %v942_v27 }
 0x4fd   : > { %1895 = vmatprep.subr.mxu1 %v941_v29 }
 0x4fe   : > { %1896 = vmatpush3.msra.mxu1 %v941_v29 }
 0x4ff   : > { %1897 = vmatprep.subr.mxu1 %v940_v20 }
 0x500   : > { %1898 = vmatpush3.msra.mxu1 %v940_v20 }
 0x501   : > { %1900 = vmatmul.mubr.msk.f32.vlgmr.msra.gmra.mxu1 %vm621_vm1, %v2468_v61  ;;  %1684 = vmatprep.subr.mxu1 %v2372_v33 }
 0x502   : > { %1083 = vmatprep.mubr.f32.mxu1 %v778_v8  ;;  %1685 = vmatpush3.msra.mxu1 %v2374_v34 }
 0x503   : > { %1686 = vmatprep.subr.mxu1 %v2376_v35 }
 0x504   : > { %1687 = vmatpush3.msra.mxu1 %v2379_v36 }
 0x505   : > { %1688 = vmatprep.subr.mxu1 %v2382_v37 }
 0x506   : > { %1689 = vmatpush3.msra.mxu1 %v2385_v38 }
 0x507   : > { %1690 = vmatprep.subr.mxu1 %v2388_v39 }
 0x508   : > { %1691 = vmatpush3.msra.mxu1 %v2391_v40 }
 0x509   : > { %1692 = vmatprep.subr.mxu1 %v2394_v41 }
 0x50a   : > { %1693 = vmatpush3.msra.mxu1 %v2397_v42 }
 0x50b   : > { %1694 = vmatprep.subr.mxu1 %v2400_v43 }
 0x50c   : > { %1695 = vmatpush3.msra.mxu1 %v2403_v44 }
 0x50d   : > { %1696 = vmatprep.subr.mxu1 %v2406_v45 }
 0x50e   : > { %1697 = vmatpush3.msra.mxu1 %v2409_v46 }
 0x50f   : > { %1698 = vmatprep.subr.mxu1 %v2412_v47 }
 0x510   : > { %1699 = vmatpush3.msra.mxu1 %v2415_v48 }
 0x511   : > { %1700 = vmatprep.subr.mxu1 %v2418_v49 }
 0x512   : > { %1701 = vmatpush3.msra.mxu1 %v2421_v50 }
 0x513   : > { %1702 = vmatprep.subr.mxu1 %v2424_v51 }
 0x514   : > { %1703 = vmatpush3.msra.mxu1 %v2427_v52 }
 0x515   : > { %1704 = vmatprep.subr.mxu1 %v2430_v53 }
 0x516   : > { %1705 = vmatpush3.msra.mxu1 %v2433_v54 }
 0x517   : > { %1706 = vmatprep.subr.mxu1 %v2436_v55 }
 0x518   : > { %1707 = vmatpush3.msra.mxu1 %v2439_v56 }
 0x519   : > { %1708 = vmatprep.subr.mxu1 %v2442_v57 }
 0x51a   : > { %1709 = vmatpush3.msra.mxu1 %v2445_v58 }
 0x51b   : > { %1710 = vmatprep.subr.mxu1 %v2448_v59 }
 0x51c   : > { %1711 = vmatpush3.msra.mxu1 %v2451_v60 }
 0x51d   : > { %1712 = vmatprep.subr.mxu1 %v2730_v21 }
 0x51e   : > { %1713 = vmatpush3.msra.mxu1 %v2504_v62 }
 0x51f   : > { %1714 = vmatprep.subr.mxu1 %v2507_v63 }
 0x520   : > { %1715 = vmatpush3.msra.mxu1 %v2510_v18 }
 0x5c1   : > { %v1901_v0 = vpop.f32.mrf.mxu1 }
 0x5c3   : > { %v1010_v2 = vpop.f32.mrf.mxu1 }
 0x5c4   : > { %1084 = vmatmul.mubr.f32.vlgmr.msra.gmra.mxu1 %v1010_v2 }
 0x5c5   : > { %1088 = vmatprep.mubr.f32.mxu1 %v779_v11 }
 0x5c8   : > { %1089 = vmatmul.mubr.f32.gmra.mxu1 %v1901_v0 }
 0x5c9   : > { %1955 = vmatprep.mubr.msk.f32.mxu1 %vm621_vm1, %v2368_v32 }
 0x684   : > { %v1716_v3 = vpop.f32.mrf.mxu1 }
 0x686   : > { %v1717_v5 = vpop.f32.mrf.mxu1 }
 0x687   : > { %v1718_v6 = vadd.f32 %v1717_v5, %v1716_v3 }
 0x688   : > { %v1719_v7 = vpop.f32.mrf.mxu1 }
 0x689   : > { %v1086_v8 = vadd.f32 %v1718_v6, %v2549_v1 }
 0x68a   : > { %v1720_v9 = vpop.f32.mrf.mxu1 }
 0x68b   : > { %v1094_v12 = vmax.f32 %v1086_v8, 0.0  ;;  %v1721_v13 = vadd.f32 %v1720_v9, %v1719_v7 }
 0x68d   : > { %v2612_v14 = vadd.f32 %v1721_v13, %v2549_v1  ;;  %1934 = vmatprep.mubr.f32.mxu0 %v1094_v12 }
 0x68f   : > { %v1095_v10 = vmax.f32 %v2612_v14, 0.0 }
 0x691   : > { %1935 = vmatmul.mubr.f32.vlgmr.msra.gmra.mxu0 %v1095_v10 }
 0x692   : > { %1941 = vmatprep.mubr.msk.f32.mxu0 %vm487_vm0, %v2348_v19 }
 0x751   : > { %v1936_v32 = vpop.f32.mrf.mxu0 }
 0x752   : > { %1937 = vmatprep.subr.mxu0 %v1936_v32 }
 0x753   : > { %v1162_v11 = vpop.f32.mrf.mxu0  ;;  %1938 = vmatpush3.msra.mxu0 %v1936_v32 }
 0x754   : > { %1939 = vmatprep.subr.mxu0 %v1162_v11 }
 0x755   : > { %1940 = vmatpush3.msra.mxu0 %v1162_v11 }
 0x756   : > { %1942 = vmatmul.mubr.msk.f32.vlgmr.msra.gmra.mxu0 %vm487_vm0, %v2356_v28  ;;  %1752 = vmatprep.subr.mxu0 %v2372_v33 }
 0x757   : > { %1944 = vmatprep.mubr.msk.f32.mxu0 %vm487_vm0, %v2358_v30  ;;  %1753 = vmatpush3.msra.mxu0 %v2374_v34 }
 0x758   : > { %1754 = vmatprep.subr.mxu0 %v2376_v35 }
 0x759   : > { %1755 = vmatpush3.msra.mxu0 %v2379_v36 }
 0x75a   : > { %1945 = vmatmul.mubr.msk.f32.gmra.mxu0 %vm487_vm0, %v2362_v31  ;;  %1756 = vmatprep.subr.mxu0 %v2382_v37 }
 0x75b   : > { %1399 = vmatprep.mubr.f32.mxu0 %v1094_v12  ;;  %1757 = vmatpush3.msra.mxu0 %v2385_v38 }
 0x75c   : > { %1758 = vmatprep.subr.mxu0 %v2388_v39 }
 0x75d   : > { %1759 = vmatpush3.msra.mxu0 %v2391_v40 }
 0x75e   : > { %1760 = vmatprep.subr.mxu0 %v2394_v41 }
 0x75f   : > { %1761 = vmatpush3.msra.mxu0 %v2397_v42 }
 0x760   : > { %1762 = vmatprep.subr.mxu0 %v2400_v43 }
 0x761   : > { %1763 = vmatpush3.msra.mxu0 %v2403_v44 }
 0x762   : > { %1764 = vmatprep.subr.mxu0 %v2406_v45 }
 0x763   : > { %1765 = vmatpush3.msra.mxu0 %v2409_v46 }
 0x764   : > { %1766 = vmatprep.subr.mxu0 %v2412_v47 }
 0x765   : > { %1767 = vmatpush3.msra.mxu0 %v2415_v48 }
 0x766   : > { %1768 = vmatprep.subr.mxu0 %v2418_v49 }
 0x767   : > { %1769 = vmatpush3.msra.mxu0 %v2421_v50 }
 0x768   : > { %1770 = vmatprep.subr.mxu0 %v2424_v51 }
 0x769   : > { %1771 = vmatpush3.msra.mxu0 %v2427_v52 }
 0x76a   : > { %1772 = vmatprep.subr.mxu0 %v2430_v53 }
 0x76b   : > { %1773 = vmatpush3.msra.mxu0 %v2433_v54 }
 0x76c   : > { %1774 = vmatprep.subr.mxu0 %v2436_v55 }
 0x76d   : > { %1775 = vmatpush3.msra.mxu0 %v2439_v56 }
 0x76e   : > { %1776 = vmatprep.subr.mxu0 %v2442_v57 }
 0x76f   : > { %1777 = vmatpush3.msra.mxu0 %v2445_v58 }
 0x770   : > { %1778 = vmatprep.subr.mxu0 %v2448_v59 }
 0x771   : > { %1779 = vmatpush3.msra.mxu0 %v2451_v60 }
 0x772   : > { %1780 = vmatprep.subr.mxu0 %v2730_v21 }
 0x773   : > { %1781 = vmatpush3.msra.mxu0 %v2504_v62 }
 0x774   : > { %1782 = vmatprep.subr.mxu0 %v2507_v63 }
 0x775   : > { %1783 = vmatpush3.msra.mxu0 %v2510_v18 }
 0x816   : > { %v1943_v19 = vpop.f32.mrf.mxu0 }
 0x817   : > { %v1243_v34 = vadd.f32 %v1943_v19, %v2462_v4 }
 0x818   : > { %v1237_v28 = vpop.f32.mrf.mxu0 }
 0x819   : > { %v1238_v37 = vadd.f32 %v2462_v4, %v1237_v28  ;;  %v1257_v39 = vmax.f32 %v1243_v34, 0.0 }
 0x81a   : > { %v1946_v30 = vpop.f32.mrf.mxu0 }
 0x81b   : > { %v1253_v31 = vadd.f32 %v1946_v30, %v2462_v4  ;;  %v1256_v40 = vmax.f32 %v1238_v37, 0.0 }
 0x81c   : > { %v1247_v33 = vpop.f32.mrf.mxu0 }
 0x81d   : > { %v1259_v35 = vmax.f32 %v1253_v31, 0.0  ;;  %v1248_v36 = vadd.f32 %v2462_v4, %v1247_v33 }
 0x81f   : > { %v1258_v38 = vmax.f32 %v1248_v36, 0.0  ;;  %1947 = vmatprep.subr.mxu1 %v1259_v35 }
 0x820   : > { %1948 = vmatpush3.msra.mxu1 %v1259_v35 }
 0x821   : > { %1949 = vmatprep.subr.mxu1 %v1258_v38 }
 0x822   : > { %1950 = vmatpush3.msra.mxu1 %v1258_v38 }
 0x823   : > { %1951 = vmatprep.subr.mxu1 %v1257_v39 }
 0x824   : > { %1952 = vmatpush3.msra.mxu1 %v1257_v39 }
 0x825   : > { %1953 = vmatprep.subr.mxu1 %v1256_v40 }
 0x826   : > { %1954 = vmatpush3.msra.mxu1 %v1256_v40 }
 0x827   : > { %1956 = vmatmul.mubr.msk.f32.vlgmr.msra.gmra.mxu1 %vm621_vm1, %v2468_v61 }
 0x8e7   : > { %v1957_v41 = vpop.f32.mrf.mxu1 }
 0x8e9   : > { %v1326_v42 = vpop.f32.mrf.mxu1 }
 0x8ea   : > { %1400 = vmatmul.mubr.f32.vlgmr.msra.gmra.mxu0 %v1326_v42 }
 0x8eb   : > { %1404 = vmatprep.mubr.f32.mxu0 %v1095_v10 }
 0x8ee   : > { %1405 = vmatmul.mubr.f32.gmra.mxu0 %v1957_v41 }
 0x9aa   : > { %v1784_v43 = vpop.f32.mrf.mxu0 }
 0x9ac   : > { %v1785_v44 = vpop.f32.mrf.mxu0 }
 0x9ad   : > { %v1786_v45 = vadd.f32 %v1785_v44, %v1784_v43 }
 0x9ae   : > { %v1787_v46 = vpop.f32.mrf.mxu0 }
 0x9af   : > { %v1402_v47 = vadd.f32 %v1786_v45, %v2549_v1 }
 0x9b0   : > { %v1788_v48 = vpop.f32.mrf.mxu0 }
 0x9b1   : > { %v1410_v49 = vmax.f32 %v1402_v47, 0.0  ;;  %v1789_v50 = vadd.f32 %v1788_v48, %v1787_v46 }
 0x9b3   : > { %1412 = vst [vmem:[%s316_s18] sm:$0xff] %v1410_v49  ;;  %v1407_v51 = vadd.f32 %v1789_v50, %v2549_v1 }
 0x9b5   : > { %v1411_v52 = vmax.f32 %v1407_v51, 0.0 }
 0x9b7   : > { %1413 = vst [vmem:[%s316_s18 + $0x8] sm:$0xff] %v1411_v52 }
 0x9b8   : > { %2052 = shalt.err (!%p2049_p0)
}
 0x9b9   : > { %s2053_s13 = scalar_lea.hbm %s2674_s29, 256  ;;  %s2057_s16 = scalar_lea.hbm %s2723_s7, 1024 }
 0x9ba   : > { %p2054_p1 = scmp.ne.s32.totalorder %s2674_s29, %s2053_s13  ;;  %p2058_p4 = scmp.lt.s32.totalorder %s2674_s29, %s2723_s7 }
 0x9bb   : > { %p2059_p7 = scmp.lt.s32.totalorder %s2057_s16, %s2053_s13 }
 0x9bc   : > { %p2055_p2 = pnand %p2054_p1, %p2189_p5 }
 0x9bd   : > { %p2060_p8 = por %p2059_p7, %p2058_p4 }
 0x9be   : > { %p2056_p3 = pneg %p2055_p2 }
 0x9c0   : > { %p2061_p6 = pnand %p2060_p8, %p2056_p3 }
 0x9c2   : > { %2064 = shalt.err (!%p2061_p6)
}
 0x9c3   : > { %s2109_s21 = smov 128   ;;  %s2110_s23 = smov 8  }
 0x9c4   : > { %1962 = dma.vmem_to_hbm [thread:$0]  (%p2189_p5), %s2669_s19, 256, %s2674_s29, %s2676_s17, %s2109_s21, %s2109_s21, %s2110_s23  }
 0x9c5 PF: > { %p1974_p9 = scmp.ge.s32.totalorder %s2103_s27, 2  ;;  %s1443_s8 = sand.u32 1, %s2091_s24  }
 0x9c6   : > { %p2731_p10 = scmp.ne.s32.totalorder %s2727_s12, 0  ;;  %s1444_s28 = scalar_lea.sflag [#allocation4], %s1443_s8 }
 0x9c8   : > { %p1969_p11 = pnand %p1974_p9, %p2731_p10 }
 0x9ca   : > { %p1970_p12 = pneg %p1969_p11 }
 0x9cc   : > { %2086 = dma.done.wait (%p1970_p12), %s1444_s28, 256  }
 0x9cd   : > { %2088 = vsyncadd (%p1970_p12), %s1444_s28, 4294967040  ;;  %p18_p13 = scmp.ge.s32.totalorder %s2176_s30, 6   ;;  %s2732_s24 = smov %s2095_s25 }
 0x9ce   : > { %s2733_s25 = smov %s2099_s26  ;;  %s2734_s26 = smov %s2187_s10 }
 0x9cf   : > { %s2735_s27 = smov %s2176_s30  ;;  %20 = sbr.rel (!%p18_p13) target bundleno = 4 (0x4), region = 94 }
 0x9d4   :  { %1449 = vsyncpa [#allocation3], 1 }
 0x9d5   :  { %1451 = vsyncpa [#allocation3 + $0x1], 1 }
 0x9d6   :  { %1452 = vsyncpa [#allocation4], 1 }
 0x9d7   :  { %1454 = vsyncpa [#allocation4 + $0x1], 1 }

</bundles_post_ra>
